<compile_context>
chip_gen: v7x
topology: tpu7x:2x2x1
jax: 0.10.0
libtpu: 0.0.40
codegen_flags: <defaults>
</compile_context>

<pallas_src>
import functools

import jax
import jax.numpy as jnp
from jax import lax
from jax.experimental import pallas as pl
from jax.experimental.pallas import tpu as pltpu


def _random_el_kernel(base_ref, src_ref, flow_ref, out_ref, *, H, W, onehot_dtype):
    """One output-pixel tile per grid step; all batch elements in the block.

    base_ref : (2, P_T)   f32  row0 = i*H/(H-1)-0.5, row1 = j*W/(W-1)-0.5
    src_ref  : (N, C, P)       full flattened source, resident across tiles
    flow_ref : (N, 2, P_T)     ch0 -> row (y) displacement, ch1 -> col (x)
    out_ref  : (N, C, P_T)
    """
    N, C, P = src_ref.shape
    sy = H / (H - 1.0)          # hoisted constants (folded normalize chain)
    sx = W / (W - 1.0)

    iy_base = base_ref[0:1, :]  # (1, P_T)
    ix_base = base_ref[1:2, :]  # (1, P_T)

    # q-axis iota reused for every batch element; only (P, 1) ever materializes.
    q = lax.broadcasted_iota(jnp.int32, (P, 1), 0)

    for n in range(N):  # static unroll; N is a small batch dim
        fy = flow_ref[n, 0:1, :]                       # (1, P_T)
        fx = flow_ref[n, 1:2, :]

        # folded: iy = ((2*((i+fy)/(H-1)-0.5)+1)*H-1)/2 == (i+fy)*H/(H-1)-0.5
        iy_r = jnp.round(iy_base + fy * sy)            # round-half-even (nearest)
        ix_r = jnp.round(ix_base + fx * sx)

        # padding_mode='zeros': out-of-bounds reads contribute 0
        inb = ((iy_r >= 0.0) & (iy_r <= H - 1.0) &
               (ix_r >= 0.0) & (ix_r <= W - 1.0))
        flat = jnp.where(inb, iy_r * W + ix_r, -1.0).astype(jnp.int32)  # (1, P_T)

        # one-hot gather matrix for this tile: onehot[p_src, p_out] = (p_src == flat[p_out])
        onehot = (q == flat).astype(onehot_dtype)      # (P, P_T)

        # gather as matmul on the MXU: (C, P) @ (P, P_T) -> (C, P_T)
        out_ref[n] = jnp.dot(src_ref[n], onehot,
                             preferred_element_type=jnp.float32).astype(out_ref.dtype)


def _pick_pixel_tile(P, onehot_itemsize, max_onehot_bytes=8 << 20):
    """Pick an output-pixel tile: multiple of 128, divides P, one-hot <= ~8 MiB,
    and (if possible) leaves >= 2 tiles so megacore / pipelining has work."""
    target = min(512, max(128, (max_onehot_bytes // max(1, P * onehot_itemsize))))
    target = max(128, (target // 128) * 128)
    cands = [d for d in range(128, min(P, target) + 1, 128) if P % d == 0]
    if not cands:
        return P  # fall back: single tile equal to the full axis
    multi = [d for d in cands if P // d >= 2]
    return max(multi) if multi else max(cands)


def random_el_forward(x, key, *, grid_size, mag, prob):
    """JAX/Pallas equivalent of Random_EL.forward (fresh-draw branch)."""
    N, C, H, W = x.shape
    P = H * W

    k_apply, k_flow = jax.random.split(key)
    apply = jax.random.uniform(k_apply, ()) < prob     # torch.rand(1) < prob

    # flow = 2*(rand - 0.5)*mag, shape [N, dim, grid, grid]  (cheap, always drawn)
    flow = 2.0 * (jax.random.uniform(k_flow, (N, 2, grid_size, grid_size),
                                     dtype=jnp.float32) - 0.5) * mag

    onehot_dtype = jnp.bfloat16 if x.dtype == jnp.bfloat16 else jnp.float32
    P_T = _pick_pixel_tile(P, jnp.dtype(onehot_dtype).itemsize)
    num_tiles = P // P_T

    def _warp(ops):
        xx, fl = ops
        if (grid_size, grid_size) != (H, W):
            # F.interpolate(flow, (H, W), mode='bicubic') — glue in plain JAX.
            # TODO(synk): PyTorch bicubic border handling may differ marginally
            # from jax.image.resize near the image edges.
            fl = jax.image.resize(fl, (N, 2, H, W), method="cubic")

        src_flat = xx.reshape(N, C, P)
        flow_flat = fl.reshape(N, 2, P).astype(jnp.float32)

        # Shape-only identity-grid terms with the normalize chain pre-folded.
        # Constant under jit (no runtime wrapper cost), removes the in-kernel
        # integer divide / mod.
        sy = H / (H - 1.0)
        sx = W / (W - 1.0)
        pix = jnp.arange(P, dtype=jnp.int32)
        row = (pix // W).astype(jnp.float32)
        col = (pix % W).astype(jnp.float32)
        base = jnp.stack([row * sy - 0.5, col * sx - 0.5], axis=0)  # (2, P)

        # VMEM budget estimate (one-hot + mask, resident src, flow/base/out
        # double buffers, sublane padding) with headroom; clamped so it stays
        # within every generation's scoped/physical VMEM (v5e 16 MiB default,
        # v7x 64 MiB physical).
        xisz = jnp.dtype(xx.dtype).itemsize
        ohsz = jnp.dtype(onehot_dtype).itemsize
        vmem_est = (3 * P * P_T * ohsz
                    + 2 * N * max(C, 8) * P * xisz
                    + 4 * 8 * P_T * 4 * (N + 1)
                    + 2 * N * max(C, 8) * P_T * xisz)
        vmem_limit = int(min(max(2 * vmem_est, 8 << 20), 40 << 20))

        kernel = functools.partial(_random_el_kernel, H=H, W=W,
                                   onehot_dtype=onehot_dtype)
        warped_flat = pl.pallas_call(
            kernel,
            out_shape=jax.ShapeDtypeStruct((N, C, P), xx.dtype),
            grid_spec=pltpu.PrefetchScalarGridSpec(
                num_scalar_prefetch=0,
                grid=(num_tiles,),
                in_specs=[
                    pl.BlockSpec((2, P_T), lambda t: (0, t)),        # base grid
                    pl.BlockSpec((N, C, P), lambda t: (0, 0, 0)),    # src, resident
                    pl.BlockSpec((N, 2, P_T), lambda t: (0, 0, t)),  # flow tile
                ],
                out_specs=pl.BlockSpec((N, C, P_T), lambda t: (0, 0, t)),
            ),
            compiler_params=pltpu.CompilerParams(
                dimension_semantics=("parallel",),
                vmem_limit_bytes=vmem_limit,
            ),
        )(base, src_flat, flow_flat)
        return warped_flat.reshape(N, C, H, W)

    # Probabilistic application: lax.cond skips the resize + kernel entirely
    # at runtime when the augmentation is not applied.
    # TODO(synk): stateful self.last_applied / self.reuse bookkeeping has no
    # clean functional Pallas equivalent and is omitted.
    return lax.cond(apply, _warp, lambda ops: ops[0], (x, flow))


if __name__ == "__main__":
    key = jax.random.PRNGKey(0)
    k_x, k_aug = jax.random.split(key)

    # img_size=(16,16), grid_size=16 (flow already at image resolution), mag=2.0
    N, C, H, W = 2, 4, 16, 16
    x = jax.random.normal(k_x, (N, C, H, W), dtype=jnp.float32)

    # 1) Augmentation forced on (prob=1) so the Pallas kernel path definitely runs.
    fwd = jax.jit(functools.partial(random_el_forward,
                                    grid_size=16, mag=2.0, prob=1.0))
    out = fwd(x, k_aug)
    jax.block_until_ready(out)
    assert out.shape == x.shape and out.dtype == x.dtype

    # 2) Zero-magnitude flow: per the module's mixed align_corners conventions,
    #    interior pixels are copied unchanged and the last row/column is zeroed.
    out_id = jax.jit(functools.partial(random_el_forward,
                                       grid_size=16, mag=0.0, prob=1.0))(x, k_aug)
    jax.block_until_ready(out_id)
    assert jnp.allclose(out_id[:, :, :H - 1, :W - 1], x[:, :, :H - 1, :W - 1])
    assert jnp.all(out_id[:, :, H - 1, :] == 0.0)
    assert jnp.all(out_id[:, :, :, W - 1] == 0.0)

    # 3) prob=0: kernel is skipped at runtime, input returned unchanged.
    out_skip = jax.jit(functools.partial(random_el_forward,
                                         grid_size=16, mag=2.0, prob=0.0))(x, k_aug)
    jax.block_until_ready(out_skip)
    assert jnp.array_equal(out_skip, x)

    print("KERNEL_OK")
</pallas_src>

<mosaic_0001>
module attributes {stable_mosaic.version = 11 : i64} {
  func.func @_random_el_kernel(%arg0: i32, %arg1: memref<2x128xf32, #tpu.memory_space<vmem>>, %arg2: memref<2x4x256xf32, #tpu.memory_space<vmem>>, %arg3: memref<2x2x128xf32, #tpu.memory_space<vmem>>, %arg4: memref<2x4x128xf32, #tpu.memory_space<vmem>>) attributes {dimension_semantics = [#tpu.dimension_semantics<parallel>], iteration_bounds = array<i64: 2>, scalar_prefetch = 0 : i64, scratch_operands = 0 : i64, tpu.core_type = #tpu.core_type<tc>, window_params = [{transform_indices = @transform_0, window_bounds = array<i64: 2, 128>}, {pipeline_mode = #tpu.pipeline_mode<synchronous>, transform_indices = @transform_1, window_bounds = array<i64: 2, 4, 256>}, {transform_indices = @transform_2, window_bounds = array<i64: 2, 2, 128>}, {transform_indices = @transform_3, window_bounds = array<i64: 2, 4, 128>}]} {
    %c0 = arith.constant 0 : index
    %c0_0 = arith.constant 0 : index
    %0 = vector.load %arg1[%c0, %c0_0] : memref<2x128xf32, #tpu.memory_space<vmem>>, vector<1x128xf32>
    %c1 = arith.constant 1 : index
    %c0_1 = arith.constant 0 : index
    %1 = vector.load %arg1[%c1, %c0_1] : memref<2x128xf32, #tpu.memory_space<vmem>>, vector<1x128xf32>
    %2 = tpu.iota {dimensions = array<i32: 0>} : vector<256x1xi32>
    %c0_2 = arith.constant 0 : index
    %c0_3 = arith.constant 0 : index
    %c0_4 = arith.constant 0 : index
    %3 = vector.load %arg3[%c0_2, %c0_3, %c0_4] : memref<2x2x128xf32, #tpu.memory_space<vmem>>, vector<1x1x128xf32>
    %4 = vector.shape_cast %3 : vector<1x1x128xf32> to vector<1x128xf32>
    %c0_5 = arith.constant 0 : index
    %c1_6 = arith.constant 1 : index
    %c0_7 = arith.constant 0 : index
    %5 = vector.load %arg3[%c0_5, %c1_6, %c0_7] : memref<2x2x128xf32, #tpu.memory_space<vmem>>, vector<1x1x128xf32>
    %6 = vector.shape_cast %5 : vector<1x1x128xf32> to vector<1x128xf32>
    %cst = arith.constant 1.06666672 : f32
    %7 = vector.broadcast %cst : f32 to vector<1x128xf32>
    %8 = arith.mulf %4, %7 : vector<1x128xf32>
    %9 = arith.addf %0, %8 : vector<1x128xf32>
    %10 = math.roundeven %9 : vector<1x128xf32>
    %cst_8 = arith.constant 1.06666672 : f32
    %11 = vector.broadcast %cst_8 : f32 to vector<1x128xf32>
    %12 = arith.mulf %6, %11 : vector<1x128xf32>
    %13 = arith.addf %1, %12 : vector<1x128xf32>
    %14 = math.roundeven %13 : vector<1x128xf32>
    %cst_9 = arith.constant 0.000000e+00 : f32
    %15 = vector.broadcast %cst_9 : f32 to vector<1x128xf32>
    %16 = arith.cmpf oge, %10, %15 : vector<1x128xf32>
    %cst_10 = arith.constant 1.500000e+01 : f32
    %17 = vector.broadcast %cst_10 : f32 to vector<1x128xf32>
    %18 = arith.cmpf ole, %10, %17 : vector<1x128xf32>
    %19 = arith.andi %16, %18 : vector<1x128xi1>
    %cst_11 = arith.constant 0.000000e+00 : f32
    %20 = vector.broadcast %cst_11 : f32 to vector<1x128xf32>
    %21 = arith.cmpf oge, %14, %20 : vector<1x128xf32>
    %22 = arith.andi %19, %21 : vector<1x128xi1>
    %cst_12 = arith.constant 1.500000e+01 : f32
    %23 = vector.broadcast %cst_12 : f32 to vector<1x128xf32>
    %24 = arith.cmpf ole, %14, %23 : vector<1x128xf32>
    %25 = arith.andi %22, %24 : vector<1x128xi1>
    %cst_13 = arith.constant 1.600000e+01 : f32
    %26 = vector.broadcast %cst_13 : f32 to vector<1x128xf32>
    %27 = arith.mulf %10, %26 : vector<1x128xf32>
    %28 = arith.addf %27, %14 : vector<1x128xf32>
    %cst_14 = arith.constant -1.000000e+00 : f32
    %29 = vector.broadcast %cst_14 : f32 to vector<1x128xf32>
    %30 = arith.select %25, %28, %29 : vector<1x128xi1>, vector<1x128xf32>
    %31 = arith.fptosi %30 : vector<1x128xf32> to vector<1x128xi32>
    %32 = vector.broadcast %2 : vector<256x1xi32> to vector<256x128xi32>
    %33 = vector.broadcast %31 : vector<1x128xi32> to vector<256x128xi32>
    %34 = arith.cmpi eq, %32, %33 : vector<256x128xi32>
    %35 = arith.extui %34 : vector<256x128xi1> to vector<256x128xi32>
    %36 = arith.sitofp %35 : vector<256x128xi32> to vector<256x128xf32>
    %c0_15 = arith.constant 0 : index
    %c0_16 = arith.constant 0 : index
    %c0_17 = arith.constant 0 : index
    %37 = vector.load %arg2[%c0_15, %c0_16, %c0_17] : memref<2x4x256xf32, #tpu.memory_space<vmem>>, vector<1x4x256xf32>
    %38 = vector.shape_cast %37 : vector<1x4x256xf32> to vector<4x256xf32>
    %cst_18 = arith.constant dense<0.000000e+00> : vector<4x128xf32>
    %39 = tpu.matmul %38, %36, %cst_18 {dimension_numbers = #tpu.dot_dimension_numbers<[1], [0], [0], [1], [0, 0, 1, 1], [], []>} : vector<4x256xf32>, vector<256x128xf32>, vector<4x128xf32> -> vector<4x128xf32>
    %c0_19 = arith.constant 0 : index
    %c0_20 = arith.constant 0 : index
    %c0_21 = arith.constant 0 : index
    %40 = vector.load %arg4[%c0_19, %c0_20, %c0_21] : memref<2x4x128xf32, #tpu.memory_space<vmem>>, vector<1x4x128xf32>
    %41 = vector.shape_cast %40 : vector<1x4x128xf32> to vector<4x128xf32>
    %42 = vector.shape_cast %39 : vector<4x128xf32> to vector<1x4x128xf32>
    tpu.vector_store %arg4[%c0_19, %c0_20, %c0_21], %42 {strides = array<i32>} : memref<2x4x128xf32, #tpu.memory_space<vmem>>, vector<1x4x128xf32>,
    %c1_22 = arith.constant 1 : index
    %c0_23 = arith.constant 0 : index
    %c0_24 = arith.constant 0 : index
    %43 = vector.load %arg3[%c1_22, %c0_23, %c0_24] : memref<2x2x128xf32, #tpu.memory_space<vmem>>, vector<1x1x128xf32>
    %44 = vector.shape_cast %43 : vector<1x1x128xf32> to vector<1x128xf32>
    %c1_25 = arith.constant 1 : index
    %c1_26 = arith.constant 1 : index
    %c0_27 = arith.constant 0 : index
    %45 = vector.load %arg3[%c1_25, %c1_26, %c0_27] : memref<2x2x128xf32, #tpu.memory_space<vmem>>, vector<1x1x128xf32>
    %46 = vector.shape_cast %45 : vector<1x1x128xf32> to vector<1x128xf32>
    %cst_28 = arith.constant 1.06666672 : f32
    %47 = vector.broadcast %cst_28 : f32 to vector<1x128xf32>
    %48 = arith.mulf %44, %47 : vector<1x128xf32>
    %49 = arith.addf %0, %48 : vector<1x128xf32>
    %50 = math.roundeven %49 : vector<1x128xf32>
    %cst_29 = arith.constant 1.06666672 : f32
    %51 = vector.broadcast %cst_29 : f32 to vector<1x128xf32>
    %52 = arith.mulf %46, %51 : vector<1x128xf32>
    %53 = arith.addf %1, %52 : vector<1x128xf32>
    %54 = math.roundeven %53 : vector<1x128xf32>
    %cst_30 = arith.constant 0.000000e+00 : f32
    %55 = vector.broadcast %cst_30 : f32 to vector<1x128xf32>
    %56 = arith.cmpf oge, %50, %55 : vector<1x128xf32>
    %cst_31 = arith.constant 1.500000e+01 : f32
    %57 = vector.broadcast %cst_31 : f32 to vector<1x128xf32>
    %58 = arith.cmpf ole, %50, %57 : vector<1x128xf32>
    %59 = arith.andi %56, %58 : vector<1x128xi1>
    %cst_32 = arith.constant 0.000000e+00 : f32
    %60 = vector.broadcast %cst_32 : f32 to vector<1x128xf32>
    %61 = arith.cmpf oge, %54, %60 : vector<1x128xf32>
    %62 = arith.andi %59, %61 : vector<1x128xi1>
    %cst_33 = arith.constant 1.500000e+01 : f32
    %63 = vector.broadcast %cst_33 : f32 to vector<1x128xf32>
    %64 = arith.cmpf ole, %54, %63 : vector<1x128xf32>
    %65 = arith.andi %62, %64 : vector<1x128xi1>
    %cst_34 = arith.constant 1.600000e+01 : f32
    %66 = vector.broadcast %cst_34 : f32 to vector<1x128xf32>
    %67 = arith.mulf %50, %66 : vector<1x128xf32>
    %68 = arith.addf %67, %54 : vector<1x128xf32>
    %cst_35 = arith.constant -1.000000e+00 : f32
    %69 = vector.broadcast %cst_35 : f32 to vector<1x128xf32>
    %70 = arith.select %65, %68, %69 : vector<1x128xi1>, vector<1x128xf32>
    %71 = arith.fptosi %70 : vector<1x128xf32> to vector<1x128xi32>
    %72 = vector.broadcast %2 : vector<256x1xi32> to vector<256x128xi32>
    %73 = vector.broadcast %71 : vector<1x128xi32> to vector<256x128xi32>
    %74 = arith.cmpi eq, %72, %73 : vector<256x128xi32>
    %75 = arith.extui %74 : vector<256x128xi1> to vector<256x128xi32>
    %76 = arith.sitofp %75 : vector<256x128xi32> to vector<256x128xf32>
    %c1_36 = arith.constant 1 : index
    %c0_37 = arith.constant 0 : index
    %c0_38 = arith.constant 0 : index
    %77 = vector.load %arg2[%c1_36, %c0_37, %c0_38] : memref<2x4x256xf32, #tpu.memory_space<vmem>>, vector<1x4x256xf32>
    %78 = vector.shape_cast %77 : vector<1x4x256xf32> to vector<4x256xf32>
    %cst_39 = arith.constant dense<0.000000e+00> : vector<4x128xf32>
    %79 = tpu.matmul %78, %76, %cst_39 {dimension_numbers = #tpu.dot_dimension_numbers<[1], [0], [0], [1], [0, 0, 1, 1], [], []>} : vector<4x256xf32>, vector<256x128xf32>, vector<4x128xf32> -> vector<4x128xf32>
    %c1_40 = arith.constant 1 : index
    %c0_41 = arith.constant 0 : index
    %c0_42 = arith.constant 0 : index
    %80 = vector.load %arg4[%c1_40, %c0_41, %c0_42] : memref<2x4x128xf32, #tpu.memory_space<vmem>>, vector<1x4x128xf32>
    %81 = vector.shape_cast %80 : vector<1x4x128xf32> to vector<4x128xf32>
    %82 = vector.shape_cast %79 : vector<4x128xf32> to vector<1x4x128xf32>
    tpu.vector_store %arg4[%c1_40, %c0_41, %c0_42], %82 {strides = array<i32>} : memref<2x4x128xf32, #tpu.memory_space<vmem>>, vector<1x4x128xf32>,
    return
  }
  func.func @transform_0(%arg0: i32) -> (i32, i32) {
    %c0_i32 = arith.constant 0 : i32
    %c0_i32_0 = arith.constant 0 : i32
    return %c0_i32, %arg0 : i32, i32
  }
  func.func @transform_1(%arg0: i32) -> (i32, i32, i32) {
    %c0_i32 = arith.constant 0 : i32
    %c0_i32_0 = arith.constant 0 : i32
    %c0_i32_1 = arith.constant 0 : i32
    %c0_i32_2 = arith.constant 0 : i32
    return %c0_i32, %c0_i32_0, %c0_i32_1 : i32, i32, i32
  }
  func.func @transform_2(%arg0: i32) -> (i32, i32, i32) {
    %c0_i32 = arith.constant 0 : i32
    %c0_i32_0 = arith.constant 0 : i32
    %c0_i32_1 = arith.constant 0 : i32
    return %c0_i32, %c0_i32_0, %arg0 : i32, i32, i32
  }
  func.func @transform_3(%arg0: i32) -> (i32, i32, i32) {
    %c0_i32 = arith.constant 0 : i32
    %c0_i32_0 = arith.constant 0 : i32
    %c0_i32_1 = arith.constant 0 : i32
    return %c0_i32, %c0_i32_0, %arg0 : i32, i32, i32
  }
}

</mosaic_0001>

<bundles_post_ra>
// kernel: branch_1_fun.1
= control target key start
LH: loop header
LB: loop body
LE: loop exit
PB: predicated region body
PF: predicated region fallthrough
CT: control target
= control target key end

     0   :  { %s1125_s12 = smov 0   ;;  %s1127_s13 = smov 0   ;;  %s1360_s0 = inlined_call_operand.vmem [shape: f32[2,256], index: 0, kind: input, shape index: {}]   ;;  %s1361_s1 = inlined_call_operand.vmem [shape: f32[2,4,256], index: 1, kind: input, shape index: {}]   ;;  %s1362_s2 = inlined_call_operand.vmem [shape: f32[2,2,256], index: 2, kind: input, shape index: {}]   ;;  %s1363_s3 = inlined_call_operand.vmem [shape: f32[2,4,256], index: 3, kind: output, shape index: {}]  }
   0x1   :  { %s1129_s14 = smov 0  }
   0x2 LB: > { %s1138_s15 = sadd.s32 4294967295, %s1102_s14   ;;  %s1140_s16 = sadd.s32 1, %s1102_s14   ;;  %s1102_s14 = sphi %s1129_s14, %s1367_s14   ;;  %s1098_s13 = sphi %s1127_s13, %s1366_s13   ;;  %s1094_s12 = sphi %s1125_s12, %s1365_s12  }
   0x3   : > { %s64_s17 = ssub.s32 %s1102_s14, %s1140_s16  ;;  %s67_s18 = sadd.s32 1, %s1098_s13 }
   0x4   : > { %p65_p0 = scmp.eq.s32.totalorder %s64_s17, 0  ;;  %p74_p1 = scmp.ne.s32.totalorder %s1098_s13, %s1094_s12 }
   0x5   : > { %p75_p2 = scmp.eq.s32.totalorder %s1102_s14, 0  ;;  %p104_p3 = scmp.eq.s32.totalorder %s1138_s15, 1 }
   0x6   : > { %s1148_s19 = scalar_select %p65_p0, %s1098_s13, %s67_s18  }
   0x7   : > { %p76_p4 = por %p75_p2, %p74_p1  ;;  %p1150_p5 = por %p104_p3, %p74_p1 }
   0x8   : > { %p768_p6 = scmp.ge.s32.totalorder %s1102_s14, 2 }
   0xa   : > { %129 = sbr.rel (%p768_p6) target bundleno = 24 (0x18), region = 20 }
  0x11   : > { %139 = sbr.rel (!%p76_p4) target bundleno = 24 (0x18), region = 28  ;;  %s141_s21 = sand.u32 (%p76_p4), 1, %s1098_s13  }
  0x12   : > { %s770_s22 = sshll.u32 (%p76_p4), %s1102_s14, 1  ;;  %s769_s23 = sshll.u32 (%p76_p4), %s141_s21, 2 }
  0x13   : > { %s145_s26 = scalar_lea.vmem (%p76_p4), %s1362_s2, %s770_s22  ;;  %s143_s27 = scalar_lea.vmem (%p76_p4), [#allocation2], %s769_s23 }
  0x14   : > { %v161_v0 = vld [vmem:[%s145_s26] sm:$0x3] (%p76_p4)  ;;  %v163_v1 = vld [vmem:[%s145_s26 + $0x4] sm:$0x3] (%p76_p4) }
  0x15   : > { %162 = vst [vmem:[%s143_s27] sm:$0x3] (%p76_p4), %v161_v0  ;;  %164 = vst [vmem:[%s143_s27 + $0x2] sm:$0x3] (%p76_p4), %v163_v1 }
  0x18 PF: > { %p771_p7 = scmp.ge.s32.totalorder %s1102_s14, 1  ;;  %p182_p8 = scmp.lt.s32.totalorder %s1102_s14, 3 }
  0x1a   : > { %p183_p9 = pnand %p771_p7, %p182_p8 }
  0x1b   : > { %s189_s28 = sand.u32 (!%p183_p9), 1, %s1094_s12   ;;  %p215_p10 = scmp.lt.s32.totalorder (!%p183_p9), %s1138_s15, 1  ;;  %v1163_v2 = vld [vmem:[%s1361_s1] sm:$0xff] (!%p183_p9)  ;;  %v1168_v3 = vld [vmem:[%s1361_s1 + $0x8] sm:$0xff] (!%p183_p9)  ;;  %v221_v20 = vlaneseq (!%p183_p9)  ;;  %v1104_v48 = vmov (!%p183_p9), 1.0|1.0  }
  0x1c   : > { %186 = sbr.rel (%p183_p9) target bundleno = 316 (0x13c), region = 62  ;;  %s772_s6 = sshll.u32 (!%p183_p9), %s189_s28, 2  ;;  %v375_v4 = vcombine.high (!%p183_p9), %v1163_v2, %v1163_v2  ;;  %v571_v5 = vcombine.high (!%p183_p9), %v1168_v3, %v1168_v3 }
  0x1d   : > { %s191_s8 = scalar_lea.vmem (!%p183_p9), [#allocation2], %s772_s6  ;;  %v1180_v26 = vshrl.u32 (!%p183_p9), %v221_v20, 7  ;;  %s773_s17 = sshll.u32 (!%p183_p9), %s189_s28, 3 }
  0x1e   : > { %v254_v6 = vld [vmem:[%s191_s8] sm:$0x1] (!%p183_p9)  ;;  %v255_v7 = vld [vmem:[%s191_s8 + $0x1] sm:$0x1] (!%p183_p9)  ;;  %441 = vmatprep.mubr.f32.mxu0 (!%p183_p9), %v375_v4  ;;  %637 = vmatprep.mubr.f32.mxu1 (!%p183_p9), %v571_v5  ;;  %v839_v10 = vld [vmem:[%s191_s8 + $0x2] sm:$0x1] (!%p183_p9) }
  0x1f   : > { %v256_v8 = vmul.f32 (!%p183_p9), 1.0666667, %v254_v6  ;;  %v259_v9 = vmul.f32 (!%p183_p9), 1.0666667, %v255_v7  ;;  %v840_v11 = vld [vmem:[%s191_s8 + $0x3] sm:$0x1] (!%p183_p9) }
  0x20   : > { %v451_v12 = vmul.f32 (!%p183_p9), 1.0666667, %v839_v10  ;;  %v454_v13 = vmul.f32 (!%p183_p9), 1.0666667, %v840_v11  ;;  %v275_v32 = vsub.s32 (!%p183_p9), 0, %v1180_v26  ;;  %v238_v34 = vadd.s32 (!%p183_p9), 128, %v1180_v26 }
  0x21   : > { %v239_v35 = vadd.s32 (!%p183_p9), 136, %v1180_v26  ;;  %v223_v38 = vadd.s32 (!%p183_p9), 8, %v1180_v26  ;;  %v240_v39 = vadd.s32 (!%p183_p9), 144, %v1180_v26  ;;  %v241_v40 = vadd.s32 (!%p183_p9), 152, %v1180_v26  ;;  %s214_s18 = scalar_lea.vmem (!%p183_p9), [#allocation3], %s773_s17 }
  0x22   : > { %v224_v43 = vadd.s32 (!%p183_p9), 16, %v1180_v26  ;;  %v225_v44 = vadd.s32 (!%p183_p9), 24, %v1180_v26  ;;  %v242_v45 = vadd.s32 (!%p183_p9), 160, %v1180_v26  ;;  %v243_v47 = vadd.s32 (!%p183_p9), 168, %v1180_v26 }
  0x23   : > { %s216_s7 = scalar_select %p215_p10, %s1138_s15, 1  ;;  %v226_v49 = vadd.s32 32, %v1180_v26  ;;  %v227_v50 = vadd.s32 40, %v1180_v26  ;;  %v244_v51 = vadd.s32 176, %v1180_v26  ;;  %v245_v52 = vadd.s32 184, %v1180_v26 }
  0x24   : > { %v228_v53 = vadd.s32 48, %v1180_v26  ;;  %v229_v54 = vadd.s32 56, %v1180_v26  ;;  %v246_v55 = vadd.s32 192, %v1180_v26  ;;  %v247_v56 = vadd.s32 200, %v1180_v26  ;;  %s908_s21 = sshll.u32 (%p1150_p5), %s1138_s15, 2 }
  0x25   : > { %s774_s9 = sshll.u32 %s216_s7, 1  ;;  %v230_v57 = vadd.s32 64, %v1180_v26  ;;  %v231_v58 = vadd.s32 72, %v1180_v26  ;;  %v248_v59 = vadd.s32 208, %v1180_v26  ;;  %v249_v60 = vadd.s32 216, %v1180_v26  ;;  %s653_s12 = scalar_lea.vmem (%p1150_p5), %s1363_s3, %s908_s21 }
  0x26   : > { %s218_s14 = scalar_lea.vmem %s1360_s0, %s774_s9  ;;  %v232_v61 = vadd.s32 80, %v1180_v26  ;;  %v233_v62 = vadd.s32 88, %v1180_v26  ;;  %v250_v63 = vadd.s32 224, %v1180_v26  ;;  %v251_v0 = vadd.s32 232, %v1180_v26 }
  0x27   : > { %v219_v14 = vld [vmem:[%s218_s14] sm:$0x1]  ;;  %v220_v15 = vld [vmem:[%s218_s14 + $0x1] sm:$0x1]  ;;  %v234_v1 = vadd.s32 96, %v1180_v26  ;;  %v235_v4 = vadd.s32 104, %v1180_v26 }
  0x28   : > { %v257_v16 = vadd.f32 %v256_v8, %v219_v14  ;;  %v260_v17 = vadd.f32 %v259_v9, %v220_v15  ;;  %v452_v18 = vadd.f32 %v451_v12, %v219_v14  ;;  %v455_v19 = vadd.f32 %v454_v13, %v220_v15 }
  0x29   : > { %v252_v5 = vadd.s32 240, %v1180_v26  ;;  %v253_v6 = vadd.s32 248, %v1180_v26  ;;  %v236_v7 = vadd.s32 112, %v1180_v26  ;;  %v237_v8 = vadd.s32 120, %v1180_v26 }
  0x2a   : > { %v1045_v21 = vround.rtne.f32 %v257_v16  ;;  %v1046_v22 = vround.rtne.f32 %v260_v17  ;;  %v1049_v23 = vround.rtne.f32 %v452_v18  ;;  %v1050_v24 = vround.rtne.f32 %v455_v19 }
  0x2c   : > { %vm262_vm0 = vcmp.ge.f32.partialorder %v1045_v21, 0.0  ;;  %vm263_vm1 = vcmp.le.f32.partialorder %v1045_v21, 15.0  ;;  %vm265_vm2 = vcmp.ge.f32.partialorder %v1046_v22, 0.0  ;;  %vm267_vm3 = vcmp.le.f32.partialorder %v1046_v22, 15.0 }
  0x2d   : > { %vm264_vm4 = vmand %vm262_vm0, %vm263_vm1  ;;  %v269_v25 = vmul.f32 16.0, %v1045_v21  ;;  %vm457_vm5 = vcmp.ge.f32.partialorder %v1049_v23, 0.0  ;;  %vm458_vm6 = vcmp.le.f32.partialorder %v1049_v23, 15.0  ;;  %vm460_vm8 = vcmp.ge.f32.partialorder %v1050_v24, 0.0 }
  0x2e   : > { %vm266_vm7 = vmand %vm264_vm4, %vm265_vm2  ;;  %v464_v27 = vmul.f32 16.0, %v1049_v23  ;;  %vm462_vm10 = vcmp.le.f32.partialorder %v1050_v24, 15.0 }
  0x2f   : > { %vm268_vm9 = vmand %vm266_vm7, %vm267_vm3  ;;  %v270_v28 = vadd.f32 %v1046_v22, %v269_v25 }
  0x30   : > { %vm459_vm11 = vmand %vm457_vm5, %vm458_vm6  ;;  %v465_v29 = vadd.f32 %v1050_v24, %v464_v27 }
  0x31   : > { %v271_v30 = vsel %vm268_vm9, %v270_v28, -1.0  ;;  %vm461_vm12 = vmand %vm459_vm11, %vm460_vm8 }
  0x32   : > { %v1047_v31 = vtrunc.f32 %v271_v30  ;;  %vm463_vm13 = vmand %vm461_vm12, %vm462_vm10 }
  0x33   : > { %v466_v33 = vsel %vm463_vm13, %v465_v29, -1.0 }
  0x34   : > { %v1048_v36 = vcvt.f32.s32 %v1047_v31  ;;  %v1051_v37 = vtrunc.f32 %v466_v33 }
  0x36   : > { %v1188_v41 = vrot.slane %v1048_v36, %v275_v32  ;;  %v1052_v42 = vcvt.f32.s32 %v1051_v37 }
  0x38   : > { %vm293_vm14 = vcmp.eq.s32.totalorder %v238_v34, %v1188_v41  ;;  %vm294_vm15 = vcmp.eq.s32.totalorder %v239_v35, %v1188_v41  ;;  %v1195_v46 = vrot.slane %v1052_v42, %v275_v32  ;;  %vm277_vm0 = vcmp.eq.s32.totalorder %v1180_v26, %v1188_v41 }
  0x39   : > { %vm981_vm1 = vmpackc.low %vm294_vm15, %vm293_vm14  ;;  %vm278_vm2 = vcmp.eq.s32.totalorder %v223_v38, %v1188_v41  ;;  %vm295_vm3 = vcmp.eq.s32.totalorder %v240_v39, %v1188_v41  ;;  %vm296_vm4 = vcmp.eq.s32.totalorder %v241_v40, %v1188_v41  ;;  %vm279_vm14 = vcmp.eq.s32.totalorder %v224_v43, %v1188_v41 }
  0x3a   : > { %982 = vmatprep.subr.msk.bf16.mxu0 %vm981_vm1, %v1104_v48  ;;  %vm488_vm5 = vcmp.eq.s32.totalorder %v238_v34, %v1195_v46  ;;  %vm489_vm6 = vcmp.eq.s32.totalorder %v239_v35, %v1195_v46  ;;  %vm983_vm7 = vmpackc.low %vm278_vm2, %vm277_vm0  ;;  %vm472_vm8 = vcmp.eq.s32.totalorder %v1180_v26, %v1195_v46  ;;  %vm473_vm9 = vcmp.eq.s32.totalorder %v223_v38, %v1195_v46 }
  0x3b   : > { %vm1013_vm10 = vmpackc.low %vm489_vm6, %vm488_vm5  ;;  %984 = vmatpush3.bf16.msk.msra.mxu0 %vm983_vm7, %v1104_v48  ;;  %vm490_vm11 = vcmp.eq.s32.totalorder %v240_v39, %v1195_v46  ;;  %vm491_vm12 = vcmp.eq.s32.totalorder %v241_v40, %v1195_v46  ;;  %vm280_vm15 = vcmp.eq.s32.totalorder %v225_v44, %v1188_v41  ;;  %vm474_vm1 = vcmp.eq.s32.totalorder %v224_v43, %v1195_v46 }
  0x3c   : > { %1014 = vmatprep.subr.msk.bf16.mxu1 %vm1013_vm10, %v1104_v48  ;;  %vm1015_vm13 = vmpackc.low %vm473_vm9, %vm472_vm8  ;;  %vm475_vm2 = vcmp.eq.s32.totalorder %v225_v44, %v1195_v46  ;;  %vm297_vm6 = vcmp.eq.s32.totalorder %v242_v45, %v1188_v41  ;;  %vm298_vm7 = vcmp.eq.s32.totalorder %v243_v47, %v1188_v41  ;;  %vm493_vm8 = vcmp.eq.s32.totalorder %v243_v47, %v1195_v46 }
  0x3d   : > { %1016 = vmatpush3.bf16.msk.msra.mxu1 %vm1015_vm13, %v1104_v48  ;;  %vm985_vm0 = vmpackc.low %vm296_vm4, %vm295_vm3  ;;  %vm492_vm4 = vcmp.eq.s32.totalorder %v242_v45, %v1195_v46  ;;  %vm281_vm10 = vcmp.eq.s32.totalorder %v226_v49, %v1188_v41  ;;  %vm476_vm13 = vcmp.eq.s32.totalorder %v226_v49, %v1195_v46 }
  0x3e   : > { %986 = vmatprep.subr.msk.bf16.mxu0 %vm985_vm0, %v1104_v48  ;;  %vm1017_vm5 = vmpackc.low %vm491_vm12, %vm490_vm11  ;;  %vm282_vm11 = vcmp.eq.s32.totalorder %v227_v50, %v1188_v41  ;;  %vm299_vm0 = vcmp.eq.s32.totalorder %v244_v51, %v1188_v41 }
  0x3f   : > { %1018 = vmatprep.subr.msk.bf16.mxu1 %vm1017_vm5, %v1104_v48  ;;  %vm987_vm3 = vmpackc.low %vm280_vm15, %vm279_vm14  ;;  %vm477_vm14 = vcmp.eq.s32.totalorder %v227_v50, %v1195_v46  ;;  %vm494_vm5 = vcmp.eq.s32.totalorder %v244_v51, %v1195_v46 }
  0x40   : > { %988 = vmatpush3.bf16.msk.msra.mxu0 %vm987_vm3, %v1104_v48  ;;  %vm1019_vm9 = vmpackc.low %vm475_vm2, %vm474_vm1  ;;  %vm300_vm1 = vcmp.eq.s32.totalorder %v245_v52, %v1188_v41  ;;  %vm283_vm3 = vcmp.eq.s32.totalorder %v228_v53, %v1188_v41 }
  0x41   : > { %1020 = vmatpush3.bf16.msk.msra.mxu1 %vm1019_vm9, %v1104_v48  ;;  %vm989_vm12 = vmpackc.low %vm298_vm7, %vm297_vm6  ;;  %vm495_vm6 = vcmp.eq.s32.totalorder %v245_v52, %v1195_v46  ;;  %vm478_vm9 = vcmp.eq.s32.totalorder %v228_v53, %v1195_v46 }
  0x42   : > { %990 = vmatprep.subr.msk.bf16.mxu0 %vm989_vm12, %v1104_v48  ;;  %vm1021_vm15 = vmpackc.low %vm493_vm8, %vm492_vm4  ;;  %vm284_vm4 = vcmp.eq.s32.totalorder %v229_v54, %v1188_v41  ;;  %vm301_vm12 = vcmp.eq.s32.totalorder %v246_v55, %v1188_v41 }
  0x43   : > { %1022 = vmatprep.subr.msk.bf16.mxu1 %vm1021_vm15, %v1104_v48  ;;  %vm991_vm2 = vmpackc.low %vm282_vm11, %vm281_vm10  ;;  %vm479_vm10 = vcmp.eq.s32.totalorder %v229_v54, %v1195_v46  ;;  %vm496_vm15 = vcmp.eq.s32.totalorder %v246_v55, %v1195_v46 }
  0x44   : > { %992 = vmatpush3.bf16.msk.msra.mxu0 %vm991_vm2, %v1104_v48  ;;  %vm1023_vm7 = vmpackc.low %vm477_vm14, %vm476_vm13  ;;  %vm302_vm13 = vcmp.eq.s32.totalorder %v247_v56, %v1188_v41  ;;  %vm285_vm2 = vcmp.eq.s32.totalorder %v230_v57, %v1188_v41 }
  0x45   : > { %1024 = vmatpush3.bf16.msk.msra.mxu1 %vm1023_vm7, %v1104_v48  ;;  %vm993_vm8 = vmpackc.low %vm300_vm1, %vm299_vm0  ;;  %vm497_vm0 = vcmp.eq.s32.totalorder %v247_v56, %v1195_v46  ;;  %vm480_vm7 = vcmp.eq.s32.totalorder %v230_v57, %v1195_v46 }
  0x46   : > { %994 = vmatprep.subr.msk.bf16.mxu0 %vm993_vm8, %v1104_v48  ;;  %vm1025_vm11 = vmpackc.low %vm495_vm6, %vm494_vm5  ;;  %vm286_vm5 = vcmp.eq.s32.totalorder %v231_v58, %v1188_v41  ;;  %vm303_vm8 = vcmp.eq.s32.totalorder %v248_v59, %v1188_v41 }
  0x47   : > { %1026 = vmatprep.subr.msk.bf16.mxu1 %vm1025_vm11, %v1104_v48  ;;  %vm995_vm14 = vmpackc.low %vm284_vm4, %vm283_vm3  ;;  %vm481_vm3 = vcmp.eq.s32.totalorder %v231_v58, %v1195_v46  ;;  %vm498_vm11 = vcmp.eq.s32.totalorder %v248_v59, %v1195_v46 }
  0x48   : > { %996 = vmatpush3.bf16.msk.msra.mxu0 %vm995_vm14, %v1104_v48  ;;  %vm1027_vm1 = vmpackc.low %vm479_vm10, %vm478_vm9  ;;  %vm304_vm9 = vcmp.eq.s32.totalorder %v249_v60, %v1188_v41  ;;  %vm287_vm14 = vcmp.eq.s32.totalorder %v232_v61, %v1188_v41 }
  0x49   : > { %1028 = vmatpush3.bf16.msk.msra.mxu1 %vm1027_vm1, %v1104_v48  ;;  %vm997_vm6 = vmpackc.low %vm302_vm13, %vm301_vm12  ;;  %vm499_vm12 = vcmp.eq.s32.totalorder %v249_v60, %v1195_v46  ;;  %vm482_vm1 = vcmp.eq.s32.totalorder %v232_v61, %v1195_v46 }
  0x4a   : > { %998 = vmatprep.subr.msk.bf16.mxu0 %vm997_vm6, %v1104_v48  ;;  %vm1029_vm4 = vmpackc.low %vm497_vm0, %vm496_vm15  ;;  %vm288_vm15 = vcmp.eq.s32.totalorder %v233_v62, %v1188_v41  ;;  %vm305_vm6 = vcmp.eq.s32.totalorder %v250_v63, %v1188_v41 }
  0x4b   : > { %1030 = vmatprep.subr.msk.bf16.mxu1 %vm1029_vm4, %v1104_v48  ;;  %vm999_vm10 = vmpackc.low %vm286_vm5, %vm285_vm2  ;;  %vm483_vm2 = vcmp.eq.s32.totalorder %v233_v62, %v1195_v46  ;;  %vm500_vm4 = vcmp.eq.s32.totalorder %v250_v63, %v1195_v46 }
  0x4c   : > { %1000 = vmatpush3.bf16.msk.msra.mxu0 %vm999_vm10, %v1104_v48  ;;  %vm1031_vm13 = vmpackc.low %vm481_vm3, %vm480_vm7  ;;  %vm306_vm7 = vcmp.eq.s32.totalorder %v251_v0, %v1188_v41  ;;  %vm289_vm10 = vcmp.eq.s32.totalorder %v234_v1, %v1188_v41 }
  0x4d   : > { %1032 = vmatpush3.bf16.msk.msra.mxu1 %vm1031_vm13, %v1104_v48  ;;  %vm1001_vm0 = vmpackc.low %vm304_vm9, %vm303_vm8  ;;  %vm501_vm8 = vcmp.eq.s32.totalorder %v251_v0, %v1195_v46  ;;  %vm484_vm13 = vcmp.eq.s32.totalorder %v234_v1, %v1195_v46 }
  0x4e   : > { %1002 = vmatprep.subr.msk.bf16.mxu0 %vm1001_vm0, %v1104_v48  ;;  %vm1033_vm5 = vmpackc.low %vm499_vm12, %vm498_vm11  ;;  %vm290_vm11 = vcmp.eq.s32.totalorder %v235_v4, %v1188_v41  ;;  %vm307_vm0 = vcmp.eq.s32.totalorder %v252_v5, %v1188_v41 }
  0x4f   : > { %1034 = vmatprep.subr.msk.bf16.mxu1 %vm1033_vm5, %v1104_v48  ;;  %vm1003_vm3 = vmpackc.low %vm288_vm15, %vm287_vm14  ;;  %vm485_vm14 = vcmp.eq.s32.totalorder %v235_v4, %v1195_v46  ;;  %vm502_vm5 = vcmp.eq.s32.totalorder %v252_v5, %v1195_v46 }
  0x50   : > { %1004 = vmatpush3.bf16.msk.msra.mxu0 %vm1003_vm3, %v1104_v48  ;;  %vm1035_vm9 = vmpackc.low %vm483_vm2, %vm482_vm1  ;;  %vm308_vm1 = vcmp.eq.s32.totalorder %v253_v6, %v1188_v41  ;;  %vm503_vm3 = vcmp.eq.s32.totalorder %v253_v6, %v1195_v46 }
  0x51   : > { %1036 = vmatpush3.bf16.msk.msra.mxu1 %vm1035_vm9, %v1104_v48  ;;  %vm1005_vm12 = vmpackc.low %vm306_vm7, %vm305_vm6  ;;  %vm291_vm7 = vcmp.eq.s32.totalorder %v236_v7, %v1188_v41  ;;  %vm292_vm9 = vcmp.eq.s32.totalorder %v237_v8, %v1188_v41 }
  0x52   : > { %1006 = vmatprep.subr.msk.bf16.mxu0 %vm1005_vm12, %v1104_v48  ;;  %vm1037_vm15 = vmpackc.low %vm501_vm8, %vm500_vm4  ;;  %vm486_vm8 = vcmp.eq.s32.totalorder %v236_v7, %v1195_v46  ;;  %vm487_vm12 = vcmp.eq.s32.totalorder %v237_v8, %v1195_v46 }
  0x53   : > { %1038 = vmatprep.subr.msk.bf16.mxu1 %vm1037_vm15, %v1104_v48  ;;  %vm1007_vm2 = vmpackc.low %vm290_vm11, %vm289_vm10 }
  0x54   : > { %1008 = vmatpush3.bf16.msk.msra.mxu0 %vm1007_vm2, %v1104_v48  ;;  %vm1039_vm6 = vmpackc.low %vm485_vm14, %vm484_vm13 }
  0x55   : > { %1040 = vmatpush3.bf16.msk.msra.mxu1 %vm1039_vm6, %v1104_v48  ;;  %vm1009_vm4 = vmpackc.low %vm308_vm1, %vm307_vm0 }
  0x56   : > { %1010 = vmatprep.subr.msk.bf16.mxu0 %vm1009_vm4, %v1104_v48  ;;  %vm1041_vm10 = vmpackc.low %vm503_vm3, %vm502_vm5 }
  0x57   : > { %1042 = vmatprep.subr.msk.bf16.mxu1 %vm1041_vm10, %v1104_v48  ;;  %vm1011_vm11 = vmpackc.low %vm292_vm9, %vm291_vm7 }
  0x58   : > { %1012 = vmatpush3.bf16.msk.msra.mxu0 %vm1011_vm11, %v1104_v48  ;;  %vm1043_vm13 = vmpackc.low %vm487_vm12, %vm486_vm8 }
  0x59   : > { %1044 = vmatpush3.bf16.msk.msra.mxu1 %vm1043_vm13, %v1104_v48 }
  0x5b   : > { %442 = vmatmul.mubr.f32.vlgmr.msra.gmra.mrb[0].mxu0 %v1163_v2 }
  0x5c   : > { %638 = vmatmul.mubr.f32.vlgmr.msra.gmra.mrb[0].mxu1 %v1168_v3 }
 0x12d   : > { %651 = sbr.rel (!%p1150_p5) target bundleno = 316 (0x13c), region = 70 }
 0x12e   : > { %v943_v9 = vpop.f32.mrb[0].mxu0 }
 0x12f   : > { %v978_v10 = vpop.f32.mrb[0].mxu1  ;;  %v944_v11 = vpop.f32.mrb[1].mxu0 }
 0x130   : > { %v945_v12 = vadd.f32 %v944_v11, %v943_v9  ;;  %v979_v13 = vpop.f32.mrb[1].mxu1 }
 0x131   : > { %v980_v14 = vadd.f32 %v979_v13, %v978_v10 }
 0x132   : > { %447 = vst [vmem:[%s214_s18] sm:$0xf] %v945_v12 }
 0x133   : > { %906 = vst [vmem:[%s214_s18 + $0x4] sm:$0xf] %v980_v14 }
 0x139   : > { %v669_v15 = vld [vmem:[%s214_s18] sm:$0xf] }
 0x13a   : > { %v671_v2 = vld [vmem:[%s214_s18 + $0x4] sm:$0xf]  ;;  %670 = vst [vmem:[%s653_s12] sm:$0xf] %v669_v15 }
 0x13b   : > { %672 = vst [vmem:[%s653_s12 + $0x8] sm:$0xf] %v671_v2 }
 0x13c PF: > { %p10_p11 = scmp.ge.s32.totalorder %s1140_s16, 4   ;;  %s1365_s12 = smov %s1098_s13 }
 0x13d   : > { %s1366_s13 = smov %s1148_s19  ;;  %s1367_s14 = smov %s1140_s16 }
 0x13e   :  { %12 = sbr.rel (!%p10_p11) target bundleno = 2 (0x2), region = 148 }

</bundles_post_ra>
